<compile_context>
chip_gen: v5e
topology: v5e:2x2
jax: 0.10.0
libtpu: 0.0.40
codegen_flags: <defaults>
</compile_context>

<pallas_src>
import math

import jax
import jax.numpy as jnp
from jax.experimental import pallas as pl
from jax.experimental.pallas import tpu as pltpu


def _round_up(x, m):
    return (x + m - 1) // m * m


_GELU_C = math.sqrt(2.0 / math.pi)
_GELU_C3 = _GELU_C * 0.044715


def _gelu_tanh(h):
    # 0.5*h*(1 + tanh(sqrt(2/pi)*(h + 0.044715*h^3))) with constants folded so
    # the tanh argument is h*(c + c3*h*h)  (one fewer VALU multiply; tanh on EUP).
    return 0.5 * h * (1.0 + jnp.tanh(h * (_GELU_C + _GELU_C3 * (h * h))))


def _ffn_kernel_resident(x_ref, w1_ref, b1_ref, w2_ref, b2_ref, o_ref):
    # Grid: (row tiles,).  Whole (padded) d_ff is resident in VMEM, so this is
    # a single pass: no accumulator scratch, no init/finalize phases.
    # x_ref : (tm, d_model_p)        original dtype (cast in-kernel)
    # w1_ref: (d_model_p, d_ff_p)    bf16   (constant block -> DMA'd once)
    # b1_ref: (1, d_ff_p)            f32
    # w2_ref: (d_ff_p, d_model_p)    bf16   (constant block -> DMA'd once)
    # b2_ref: (1, d_model_p)         f32
    # o_ref : (tm, d_model_p)        x.dtype
    x = x_ref[...].astype(w1_ref.dtype)
    h = jnp.dot(x, w1_ref[...], preferred_element_type=jnp.float32) + b1_ref[...]
    h = _gelu_tanh(h)
    # Dropout == identity (inference).
    y = jnp.dot(h.astype(w2_ref.dtype), w2_ref[...],
                preferred_element_type=jnp.float32)
    o_ref[...] = (y + b2_ref[...]).astype(o_ref.dtype)


def _ffn_kernel_reduce(x_ref, w1_ref, b1_ref, w2_ref, b2_ref, o_ref, acc_ref):
    # Grid: (row tiles [parallel], d_ff slabs [arbitrary / reduction]).
    # The final slab's contribution is fused straight into the output write so
    # the accumulator is neither updated nor re-read on the last iteration.
    j = pl.program_id(1)
    nj = pl.num_programs(1)

    @pl.when(j == 0)
    def _():
        acc_ref[...] = jnp.zeros_like(acc_ref)

    x = x_ref[...].astype(w1_ref.dtype)
    h = jnp.dot(x, w1_ref[...], preferred_element_type=jnp.float32) + b1_ref[...]
    h = _gelu_tanh(h)
    # Dropout == identity (inference).
    contrib = jnp.dot(h.astype(w2_ref.dtype), w2_ref[...],
                      preferred_element_type=jnp.float32)

    @pl.when(j < nj - 1)
    def _():
        acc_ref[...] += contrib

    @pl.when(j == nj - 1)
    def _():
        o_ref[...] = (acc_ref[...] + contrib + b2_ref[...]).astype(o_ref.dtype)


def positionwise_feed_forward(x, w1, b1, w2, b2, *, tm=512, max_tf=1024,
                              compute_dtype=jnp.bfloat16):
    """x: (batch, seq, d_model). Returns same shape / dtype as x.

    Both matmuls run in `compute_dtype` (bf16) on the MXU with f32
    accumulation; GELU math stays in f32.
    """
    B, S, d_model = x.shape
    d_ff = w1.shape[1]
    rows = B * S
    out_dtype = x.dtype

    x_isz = jnp.dtype(x.dtype).itemsize
    w_isz = jnp.dtype(compute_dtype).itemsize
    o_isz = jnp.dtype(out_dtype).itemsize

    # Lane-dense padding targets (multiples of 128 on the minor dims).
    d_model_p = _round_up(d_model, 128)
    d_ff_p = _round_up(d_ff, 128)

    # Chip-adaptive VMEM budget; conservative 64 MiB fallback is safe for v7x.
    try:
        vmem_cap = int(pltpu.get_tpu_info().vmem_capacity_bytes)
    except Exception:  # pragma: no cover - API / platform differences
        vmem_cap = 64 * 1024 * 1024
    budget = int(0.55 * vmem_cap)

    # Row tile: multiple of 16 sublanes, clamped for tiny inputs.  When there
    # is enough work, make sure there are >= 2 row tiles (v7x has 2 TCs).
    tm = max(16, min(_round_up(tm, 16), _round_up(rows, 16)))
    if rows > 128 and _round_up(rows, tm) // tm < 2:
        tm = _round_up((rows + 1) // 2, 16)

    def resident_fp(tm_):
        return (2 * 2 * d_model_p * d_ff_p * w_isz        # w1 + w2 (buffered)
                + 2 * tm_ * d_model_p * x_isz              # x tile (2 bufs)
                + 2 * tm_ * d_model_p * o_isz              # out tile (2 bufs)
                + tm_ * d_ff_p * (4 + w_isz)                # f32 h + bf16 copy
                + 2 * (d_ff_p + d_model_p) * 4)             # biases

    def reduce_fp(tm_, tf_):
        return (2 * 2 * d_model_p * tf_ * w_isz             # w1 / w2 slabs
                + 2 * tm_ * d_model_p * x_isz
                + 2 * tm_ * d_model_p * o_isz
                + tm_ * d_model_p * 4                        # f32 accumulator
                + tm_ * tf_ * (4 + w_isz)
                + 2 * (d_ff_p + d_model_p) * 4)

    # --- choose schedule: weight-resident single pass if it fits VMEM -------
    resident_tm = None
    for tm_try in (tm, 256, 128):
        tm_try = max(16, min(_round_up(tm_try, 16), _round_up(rows, 16)))
        if tm_try > tm:
            continue
        if resident_fp(tm_try) <= budget:
            resident_tm = tm_try
            break

    use_resident = resident_tm is not None
    if use_resident:
        tm = resident_tm
        tf = d_ff_p
    else:
        # Reduction over d_ff: tf must divide the 128-padded d_ff (no
        # over-padding); shrink (tm, tf) until the footprint fits the budget.
        def best_tf(cap):
            units = d_ff_p // 128
            best = 1
            for d in range(1, units + 1):
                if units % d == 0 and d * 128 <= cap:
                    best = d
            return best * 128

        chosen = None
        for tm_try, tf_cap in ((tm, max_tf), (tm, 512), (256, 512),
                               (128, 512), (128, 256), (128, 128)):
            tm_try = max(16, min(_round_up(tm_try, 16), _round_up(rows, 16)))
            if tm_try > tm:
                continue
            tf_try = best_tf(tf_cap)
            if reduce_fp(tm_try, tf_try) <= budget:
                chosen = (tm_try, tf_try)
                break
        if chosen is None:
            chosen = (max(16, min(128, _round_up(rows, 16))), 128)
        tm, tf = chosen

    rows_p = _round_up(rows, tm)
    n_i = rows_p // tm
    n_j = d_ff_p // tf

    # --- prepare operands (skip pads when already aligned; x cast in-kernel) -
    x2d = x.reshape(rows, d_model)
    if rows_p != rows or d_model_p != d_model:
        x2d = jnp.pad(x2d, ((0, rows_p - rows), (0, d_model_p - d_model)))
    w1_p = w1.astype(compute_dtype)
    w2_p = w2.astype(compute_dtype)
    if d_model_p != d_model or d_ff_p != d_ff:
        w1_p = jnp.pad(w1_p, ((0, d_model_p - d_model), (0, d_ff_p - d_ff)))
        w2_p = jnp.pad(w2_p, ((0, d_ff_p - d_ff), (0, d_model_p - d_model)))
    b1_p = b1.astype(jnp.float32)
    b2_p = b2.astype(jnp.float32)
    if d_ff_p != d_ff:
        b1_p = jnp.pad(b1_p, (0, d_ff_p - d_ff))
    if d_model_p != d_model:
        b2_p = jnp.pad(b2_p, (0, d_model_p - d_model))
    b1_p = b1_p.reshape(1, d_ff_p)
    b2_p = b2_p.reshape(1, d_model_p)

    # --- cost estimate: actual DMA volume ------------------------------------
    weight_bytes = 2 * d_model_p * d_ff_p * w_isz
    weight_traffic = weight_bytes if n_j == 1 else weight_bytes * n_i
    cost = pl.CostEstimate(
        flops=4 * rows_p * d_model_p * d_ff_p,         # two matmuls
        transcendentals=rows_p * d_ff_p,               # tanh per hidden elem
        bytes_accessed=(rows_p * d_model_p * x_isz
                        + weight_traffic
                        + (d_ff_p + d_model_p) * 4
                        + rows_p * d_model_p * o_isz),
    )

    fp = resident_fp(tm) if use_resident else reduce_fp(tm, tf)
    vmem_limit = int(min(max(int(fp * 1.25) + (8 << 20), 32 << 20),
                         int(0.9 * vmem_cap)))

    if use_resident:
        kernel = _ffn_kernel_resident
        grid_spec = pltpu.PrefetchScalarGridSpec(
            num_scalar_prefetch=0,
            grid=(n_i,),
            in_specs=[
                pl.BlockSpec((tm, d_model_p), lambda i: (i, 0)),      # x tile
                pl.BlockSpec((d_model_p, d_ff_p), lambda i: (0, 0)),  # w1 (resident)
                pl.BlockSpec((1, d_ff_p), lambda i: (0, 0)),          # b1
                pl.BlockSpec((d_ff_p, d_model_p), lambda i: (0, 0)),  # w2 (resident)
                pl.BlockSpec((1, d_model_p), lambda i: (0, 0)),       # b2
            ],
            out_specs=pl.BlockSpec((tm, d_model_p), lambda i: (i, 0)),
        )
        dim_sem = ("parallel",)
    else:
        kernel = _ffn_kernel_reduce
        grid_spec = pltpu.PrefetchScalarGridSpec(
            num_scalar_prefetch=0,
            grid=(n_i, n_j),
            in_specs=[
                pl.BlockSpec((tm, d_model_p), lambda i, j: (i, 0)),   # x tile
                pl.BlockSpec((d_model_p, tf), lambda i, j: (0, j)),   # w1 slab
                pl.BlockSpec((1, tf), lambda i, j: (0, j)),           # b1 slab
                pl.BlockSpec((tf, d_model_p), lambda i, j: (j, 0)),   # w2 slab
                pl.BlockSpec((1, d_model_p), lambda i, j: (0, 0)),    # b2
            ],
            out_specs=pl.BlockSpec((tm, d_model_p), lambda i, j: (i, 0)),
            scratch_shapes=[pltpu.VMEM((tm, d_model_p), jnp.float32)],
        )
        dim_sem = ("parallel", "arbitrary")

    out2d = pl.pallas_call(
        kernel,
        out_shape=jax.ShapeDtypeStruct((rows_p, d_model_p), out_dtype),
        grid_spec=grid_spec,
        compiler_params=pltpu.CompilerParams(
            dimension_semantics=dim_sem,
            vmem_limit_bytes=vmem_limit,
        ),
        cost_estimate=cost,
    )(x2d, w1_p, b1_p, w2_p, b2_p)

    if rows_p != rows or d_model_p != d_model:
        out2d = out2d[:rows, :d_model]
    return out2d.reshape(B, S, d_model)


def _reference(x, w1, b1, w2, b2):
    h = jnp.einsum("bsd,df->bsf", x, w1) + b1
    c = math.sqrt(2.0 / math.pi)
    h = 0.5 * h * (1.0 + jnp.tanh(c * (h + 0.044715 * h ** 3)))
    return jnp.einsum("bsf,fd->bsd", h, w2) + b2


if __name__ == "__main__":
    # Small shapes consistent with the module: batch=2, seq=8, d_model=32, d_ff=128.
    B, S, d_model, d_ff = 2, 8, 32, 128

    key = jax.random.PRNGKey(0)
    kx, k1, k2, k3, k4 = jax.random.split(key, 5)

    x = jax.random.normal(kx, (B, S, d_model), dtype=jnp.float32)

    # Deterministic parameter init mirroring nn.Linear default (U[-1/sqrt(fan_in), +]).
    lim1 = 1.0 / math.sqrt(d_model)
    lim2 = 1.0 / math.sqrt(d_ff)
    w1 = jax.random.uniform(k1, (d_model, d_ff), jnp.float32, -lim1, lim1)
    b1 = jax.random.uniform(k2, (d_ff,), jnp.float32, -lim1, lim1)
    w2 = jax.random.uniform(k3, (d_ff, d_model), jnp.float32, -lim2, lim2)
    b2 = jax.random.uniform(k4, (d_model,), jnp.float32, -lim2, lim2)

    out = positionwise_feed_forward(x, w1, b1, w2, b2)
    out = jax.block_until_ready(out)

    ref = _reference(x, w1, b1, w2, b2)
    assert out.shape == (B, S, d_model)
    assert out.dtype == x.dtype
    # bf16 compute path (f32 accumulation) vs f32 reference: relaxed tolerance.
    assert jnp.allclose(out, ref, atol=2e-2, rtol=2e-2), "mismatch vs reference"

    print("KERNEL_OK")
</pallas_src>

<mosaic_0001>
module attributes {stable_mosaic.version = 11 : i64} {
  func.func @_ffn_kernel_resident(%arg0: i32, %arg1: memref<16x128xf32, #tpu.memory_space<vmem>>, %arg2: memref<128x128xbf16, #tpu.memory_space<vmem>>, %arg3: memref<1x128xf32, #tpu.memory_space<vmem>>, %arg4: memref<128x128xbf16, #tpu.memory_space<vmem>>, %arg5: memref<1x128xf32, #tpu.memory_space<vmem>>, %arg6: memref<16x128xf32, #tpu.memory_space<vmem>>) attributes {dimension_semantics = [#tpu.dimension_semantics<parallel>], iteration_bounds = array<i64: 1>, scalar_prefetch = 0 : i64, scratch_operands = 0 : i64, tpu.core_type = #tpu.core_type<tc>, window_params = [{transform_indices = @transform_0, window_bounds = array<i64: 16, 128>}, {pipeline_mode = #tpu.pipeline_mode<synchronous>, transform_indices = @transform_1, window_bounds = array<i64: 128, 128>}, {pipeline_mode = #tpu.pipeline_mode<synchronous>, transform_indices = @transform_2, window_bounds = array<i64: 1, 128>}, {pipeline_mode = #tpu.pipeline_mode<synchronous>, transform_indices = @transform_3, window_bounds = array<i64: 128, 128>}, {pipeline_mode = #tpu.pipeline_mode<synchronous>, transform_indices = @transform_4, window_bounds = array<i64: 1, 128>}, {transform_indices = @transform_5, window_bounds = array<i64: 16, 128>}]} {
    %c0 = arith.constant 0 : index
    %c0_0 = arith.constant 0 : index
    %0 = vector.load %arg1[%c0, %c0_0] : memref<16x128xf32, #tpu.memory_space<vmem>>, vector<16x128xf32>
    %1 = arith.truncf %0 : vector<16x128xf32> to vector<16x128xbf16>
    %c0_1 = arith.constant 0 : index
    %c0_2 = arith.constant 0 : index
    %2 = vector.load %arg2[%c0_1, %c0_2] : memref<128x128xbf16, #tpu.memory_space<vmem>>, vector<128x128xbf16>
    %cst = arith.constant dense<0.000000e+00> : vector<16x128xf32>
    %3 = tpu.matmul %1, %2, %cst {dimension_numbers = #tpu.dot_dimension_numbers<[1], [0], [0], [1], [0, 0, 1, 1], [], []>} : vector<16x128xbf16>, vector<128x128xbf16>, vector<16x128xf32> -> vector<16x128xf32>
    %c0_3 = arith.constant 0 : index
    %c0_4 = arith.constant 0 : index
    %4 = vector.load %arg3[%c0_3, %c0_4] : memref<1x128xf32, #tpu.memory_space<vmem>>, vector<1x128xf32>
    %5 = vector.broadcast %4 : vector<1x128xf32> to vector<16x128xf32>
    %6 = arith.addf %3, %5 : vector<16x128xf32>
    %cst_5 = arith.constant 5.000000e-01 : f32
    %7 = vector.broadcast %cst_5 : f32 to vector<16x128xf32>
    %8 = arith.mulf %7, %6 : vector<16x128xf32>
    %9 = arith.mulf %6, %6 : vector<16x128xf32>
    %cst_6 = arith.constant 0.0356774069 : f32
    %10 = vector.broadcast %cst_6 : f32 to vector<16x128xf32>
    %11 = arith.mulf %10, %9 : vector<16x128xf32>
    %cst_7 = arith.constant 0.797884583 : f32
    %12 = vector.broadcast %cst_7 : f32 to vector<16x128xf32>
    %13 = arith.addf %12, %11 : vector<16x128xf32>
    %14 = arith.mulf %6, %13 : vector<16x128xf32>
    %15 = math.tanh %14 : vector<16x128xf32>
    %cst_8 = arith.constant 1.000000e+00 : f32
    %16 = vector.broadcast %cst_8 : f32 to vector<16x128xf32>
    %17 = arith.addf %16, %15 : vector<16x128xf32>
    %18 = arith.mulf %8, %17 : vector<16x128xf32>
    %19 = arith.truncf %18 : vector<16x128xf32> to vector<16x128xbf16>
    %c0_9 = arith.constant 0 : index
    %c0_10 = arith.constant 0 : index
    %20 = vector.load %arg4[%c0_9, %c0_10] : memref<128x128xbf16, #tpu.memory_space<vmem>>, vector<128x128xbf16>
    %cst_11 = arith.constant dense<0.000000e+00> : vector<16x128xf32>
    %21 = tpu.matmul %19, %20, %cst_11 {dimension_numbers = #tpu.dot_dimension_numbers<[1], [0], [0], [1], [0, 0, 1, 1], [], []>} : vector<16x128xbf16>, vector<128x128xbf16>, vector<16x128xf32> -> vector<16x128xf32>
    %c0_12 = arith.constant 0 : index
    %c0_13 = arith.constant 0 : index
    %22 = vector.load %arg5[%c0_12, %c0_13] : memref<1x128xf32, #tpu.memory_space<vmem>>, vector<1x128xf32>
    %23 = vector.broadcast %22 : vector<1x128xf32> to vector<16x128xf32>
    %24 = arith.addf %21, %23 : vector<16x128xf32>
    %c0_14 = arith.constant 0 : index
    %c0_15 = arith.constant 0 : index
    %25 = vector.load %arg6[%c0_14, %c0_15] : memref<16x128xf32, #tpu.memory_space<vmem>>, vector<16x128xf32>
    tpu.vector_store %arg6[%c0_14, %c0_15], %24 {strides = array<i32>} : memref<16x128xf32, #tpu.memory_space<vmem>>, vector<16x128xf32>,
    return
  }
  func.func @transform_0(%arg0: i32) -> (i32, i32) {
    %c0_i32 = arith.constant 0 : i32
    %c0_i32_0 = arith.constant 0 : i32
    return %arg0, %c0_i32 : i32, i32
  }
  func.func @transform_1(%arg0: i32) -> (i32, i32) {
    %c0_i32 = arith.constant 0 : i32
    %c0_i32_0 = arith.constant 0 : i32
    %c0_i32_1 = arith.constant 0 : i32
    return %c0_i32, %c0_i32_0 : i32, i32
  }
  func.func @transform_2(%arg0: i32) -> (i32, i32) {
    %c0_i32 = arith.constant 0 : i32
    %c0_i32_0 = arith.constant 0 : i32
    %c0_i32_1 = arith.constant 0 : i32
    return %c0_i32, %c0_i32_0 : i32, i32
  }
  func.func @transform_3(%arg0: i32) -> (i32, i32) {
    %c0_i32 = arith.constant 0 : i32
    %c0_i32_0 = arith.constant 0 : i32
    %c0_i32_1 = arith.constant 0 : i32
    return %c0_i32, %c0_i32_0 : i32, i32
  }
  func.func @transform_4(%arg0: i32) -> (i32, i32) {
    %c0_i32 = arith.constant 0 : i32
    %c0_i32_0 = arith.constant 0 : i32
    %c0_i32_1 = arith.constant 0 : i32
    return %c0_i32, %c0_i32_0 : i32, i32
  }
  func.func @transform_5(%arg0: i32) -> (i32, i32) {
    %c0_i32 = arith.constant 0 : i32
    %c0_i32_0 = arith.constant 0 : i32
    return %arg0, %c0_i32 : i32, i32
  }
}

</mosaic_0001>

<bundles_post_ra>
// kernel: tpu_custom_call.1
= control target key start
LH: loop header
LB: loop body
LE: loop exit
PB: predicated region body
PF: predicated region fallthrough
CT: control target
= control target key end

     0   :  { %10 = vsyncpa [#allocation3], 0  ;;  %s532_s0 = inlined_call_operand.hbm [shape: f32[16,128], index: 0, kind: input, shape index: {}]   ;;  %s533_s1 = inlined_call_operand.hbm [shape: bf16[128,128], index: 1, kind: input, shape index: {}]   ;;  %s534_s2 = inlined_call_operand.vmem [shape: f32[1,128], index: 2, kind: input, shape index: {}]   ;;  %s535_s3 = inlined_call_operand.hbm [shape: bf16[128,128], index: 3, kind: input, shape index: {}]   ;;  %s536_s4 = inlined_call_operand.vmem [shape: f32[1,128], index: 4, kind: input, shape index: {}]   ;;  %s537_s5 = inlined_call_operand.hbm [shape: f32[16,128], index: 5, kind: output, shape index: {}]  }
   0x1   :  { %11 = vsyncpa [#allocation6], 0  ;;  %s30_s20 = sshll.u32 %s533_s1, 4  ;;  %s31_s20 = int_to_ptr.hbm [resolvable:$true] %s30_s20 }
   0x2   :  { %12 = vsyncpa [#allocation4], 0  ;;  %s470_s21 = smov [#allocation5]   ;;  %s17_s25 = sshll.u32 %s532_s0, 4  ;;  %s18_s25 = int_to_ptr.hbm [resolvable:$true] %s17_s25 }
   0x3   :  { %s32_s22 = sshll.u32 %s470_s21, 4  ;;  %s471_s26 = smov 64   ;;  %s33_s22 = int_to_ptr.vmem [resolvable:$true] %s32_s22 }
   0x4   :  { %s472_s27 = smov 4   ;;  %s473_s28 = smov [#allocation2]  }
   0x5   :  { %38 = dma.hbm_to_vmem [thread:$0]  %s31_s20, 1024, %s33_s22, [#allocation6], %s471_s26, %s471_s26, %s472_s27  }
   0x6   :  { %s19_s29 = sshll.u32 %s473_s28, 4  ;;  %s474_s30 = smov 128   ;;  %s20_s29 = int_to_ptr.vmem [resolvable:$true] %s19_s29 }
   0x7   :  { %s475_s6 = smov 8   ;;  %s45_s8 = sshll.u32 %s535_s3, 4  ;;  %s46_s8 = int_to_ptr.hbm [resolvable:$true] %s45_s8 }
   0x8   :  { %25 = dma.hbm_to_vmem [thread:$0]  %s18_s25, 256, %s20_s29, [#allocation3], %s474_s30, %s474_s30, %s475_s6  }
   0x9   :  { %s476_s9 = smov [#allocation7]  }
   0xa   :  { %s47_s0 = sshll.u32 %s476_s9, 4  ;;  %s48_s0 = int_to_ptr.vmem [resolvable:$true] %s47_s0 }
   0xb   :  { %53 = dma.hbm_to_vmem [thread:$0]  %s46_s8, 1024, %s48_s0, [#allocation6], %s471_s26, %s471_s26, %s472_s27  }
   0xc   :  { %464 = dma.done.wait [#allocation3], 256  }
   0xd   :  { %465 = vsyncadd [#allocation3], 4294967040 }
   0xe   :  { %466 = dma.done.wait [#allocation6], 2048  }
   0xf   :  { %467 = vsyncadd [#allocation6], 4294965248  ;;  %v345_v0 = vld [vmem:[#allocation5 + $0x38] sm:$0xff]  ;;  %v344_v1 = vld [vmem:[#allocation5 + $0x30] sm:$0xff]  ;;  %s477_s12 = smov [#allocation8]   ;;  %s260_s16 = sshll.u32 %s537_s5, 4  ;;  %s261_s16 = int_to_ptr.hbm [resolvable:$true] %s260_s16 }
  0x10   :  { %139 = vmatpush.bf16.msra.mxu0 %v345_v0  ;;  %v343_v2 = vld [vmem:[#allocation5 + $0x28] sm:$0xff]  ;;  %v342_v3 = vld [vmem:[#allocation5 + $0x20] sm:$0xff]  ;;  %v341_v4 = vld [vmem:[#allocation5 + $0x18] sm:$0xff]  ;;  %s258_s13 = sshll.u32 %s477_s12, 4  ;;  %s259_s13 = int_to_ptr.vmem [resolvable:$true] %s258_s13 }
  0x11   :  { %v340_v5 = vld [vmem:[#allocation5 + $0x10] sm:$0xff]  ;;  %v339_v6 = vld [vmem:[#allocation5 + $0x8] sm:$0xff]  ;;  %v338_v7 = vld [vmem:[#allocation5] sm:$0xff] }
  0x12   :  { %v68_v8 = vld [vmem:[#allocation2] sm:$0xff]  ;;  %v69_v9 = vld [vmem:[#allocation2 + $0x8] sm:$0xff]  ;;  %v351_v13 = vld [vmem:[#allocation7 + $0x28] sm:$0xff] }
  0x13   :  { %v70_v10 = vpack.c.bf16 %v69_v9, %v68_v8  ;;  %v353_v11 = vld [vmem:[#allocation7 + $0x38] sm:$0xff]  ;;  %v352_v12 = vld [vmem:[#allocation7 + $0x30] sm:$0xff]  ;;  %v350_v14 = vld [vmem:[#allocation7 + $0x20] sm:$0xff] }
  0x14   :  { %140 = vmatpush.bf16.msra.mxu0 %v344_v1  ;;  %238 = vmatpush.bf16.msra.mxu1 %v353_v11  ;;  %v349_v15 = vld [vmem:[#allocation7 + $0x18] sm:$0xff]  ;;  %v348_v16 = vld [vmem:[#allocation7 + $0x10] sm:$0xff]  ;;  %v347_v17 = vld [vmem:[#allocation7 + $0x8] sm:$0xff] }
  0x15   :  { %v346_v18 = vld [vmem:[#allocation7] sm:$0xff]  ;;  %v362_v19 = vld [vmem:[%s534_s2] ss:$0 sm:$0xff] }
  0x16   :  { %v363_v41 = vld [vmem:[%s536_s4] ss:$0 sm:$0xff] }
  0x18   :  { %141 = vmatpush.bf16.msra.mxu0 %v343_v2  ;;  %239 = vmatpush.bf16.msra.mxu1 %v352_v12 }
  0x1c   :  { %142 = vmatpush.bf16.msra.mxu0 %v342_v3  ;;  %240 = vmatpush.bf16.msra.mxu1 %v351_v13 }
  0x20   :  { %143 = vmatpush.bf16.msra.mxu0 %v341_v4  ;;  %241 = vmatpush.bf16.msra.mxu1 %v350_v14 }
  0x24   :  { %144 = vmatpush.bf16.msra.mxu0 %v340_v5  ;;  %242 = vmatpush.bf16.msra.mxu1 %v349_v15 }
  0x28   :  { %145 = vmatpush.bf16.msra.mxu0 %v339_v6  ;;  %243 = vmatpush.bf16.msra.mxu1 %v348_v16 }
  0x2c   :  { %146 = vmatpush.bf16.msra.mxu0 %v338_v7  ;;  %244 = vmatpush.bf16.msra.mxu1 %v347_v17 }
  0x2f   :  { %147 = vmatmul.bf16.vlgmr.msra.gmra.mxu0 %v70_v10 }
  0x30   :  { %245 = vmatpush.bf16.msra.mxu1 %v346_v18 }
  0xac   :  { %v148_v20 = vpop.f32.mrf.mxu0 }
  0xad   :  { %v149_v21 = vadd.f32 %v362_v19, %v148_v20 }
  0xaf   :  { %v155_v22 = vmul.f32 %v149_v21, %v149_v21  ;;  %v153_v35 = vmul.f32 0.5, %v149_v21 }
  0xb1   :  { %v157_v23 = vmul.f32 0.035677407, %v155_v22 }
  0xb3   :  { %v159_v24 = vadd.f32 0.7978846, %v157_v23 }
  0xb4   :  { %v150_v25 = vpop.f32.mrf.mxu0 }
  0xb5   :  { %v151_v26 = vadd.f32 %v362_v19, %v150_v25  ;;  %v161_v27 = vmul.f32 %v159_v24, %v149_v21 }
  0xb7   :  { %v156_v28 = vmul.f32 %v151_v26, %v151_v26  ;;  %364 = vtanh.f32 %v161_v27  ;;  %v154_v36 = vmul.f32 0.5, %v151_v26 }
  0xb9   :  { %v158_v29 = vmul.f32 0.035677407, %v156_v28 }
  0xbb   :  { %v160_v30 = vadd.f32 0.7978846, %v158_v29 }
  0xbd   :  { %v162_v31 = vmul.f32 %v160_v30, %v151_v26  ;;  %v365_v32 = vpop.eup %364 }
  0xbe   :  { %v165_v33 = vadd.f32 1.0, %v365_v32 }
  0xbf   :  { %366 = vtanh.f32 %v162_v31 }
  0xc0   :  { %v167_v38 = vmul.f32 %v165_v33, %v153_v35 }
  0xc5   :  { %v367_v34 = vpop.eup %366 }
  0xc6   :  { %v166_v37 = vadd.f32 1.0, %v367_v34 }
  0xc8   :  { %v168_v39 = vmul.f32 %v166_v37, %v154_v36 }
  0xca   :  { %v169_v40 = vpack.c.bf16 %v168_v39, %v167_v38 }
  0xcc   :  { %246 = vmatmul.bf16.vlgmr.msra.gmra.mxu1 %v169_v40 }
 0x149   :  { %v247_v42 = vpop.f32.mrf.mxu1 }
 0x14a   :  { %v248_v43 = vadd.f32 %v363_v41, %v247_v42 }
 0x14c   :  { %252 = vst [vmem:[#allocation8] sm:$0xff] %v248_v43 }
 0x151   :  { %v249_v44 = vpop.f32.mrf.mxu1 }
 0x152   :  { %v250_v45 = vadd.f32 %v363_v41, %v249_v44 }
 0x154   :  { %253 = vst [vmem:[#allocation8 + $0x8] sm:$0xff] %v250_v45 }
 0x155   :  { %266 = dma.vmem_to_hbm [thread:$0]  %s259_s13, 256, %s261_s16, [#allocation4], %s474_s30, %s474_s30, %s475_s6  }
 0x156   :  { %468 = dma.done.wait [#allocation4], 256  }
 0x157   :  { %469 = vsyncadd [#allocation4], 4294967040 }
 0x158   :  { %271 = vsyncpa [#allocation3], 1 }
 0x159   :  { %272 = vsyncpa [#allocation6], 1 }
 0x15a   :  { %273 = vsyncpa [#allocation4], 1 }

</bundles_post_ra>
